<compile_context>
chip_gen: v6e
topology: v6e:2x2x1
jax: 0.10.0
libtpu: 0.0.40
codegen_flags: <defaults>
</compile_context>

<pallas_src>
import jax
import jax.numpy as jnp
from jax.experimental import pallas as pl
from jax.experimental.pallas import tpu as pltpu


def _copy_kernel(x_ref, o_ref):
    # Input and output blocks have identical shapes: pure pass-through copy.
    # Partial edge blocks on the output are masked on store, so any padded /
    # chomped columns present in the input block never reach HBM.
    o_ref[...] = x_ref[...]


def chomp1d(x: jax.Array, chomp_size: int) -> jax.Array:
    """Pallas equivalent of Chomp1d.forward. x: (N, C, L)."""
    if chomp_size < 0:
        raise ValueError("chomp_size must be non-negative")
    if chomp_size == 0:
        return x

    n, c, l = x.shape
    l_out = l - chomp_size
    if l_out <= 0:
        raise ValueError("chomp_size must be smaller than the sequence length")

    total_rows = n * c
    x2 = x.reshape(total_rows, l)

    itemsize = jnp.dtype(x.dtype).itemsize
    pack = {4: 8, 2: 16, 1: 32}.get(itemsize, 8)  # sublane packing per dtype width
    lane = 128

    # --- Per-generation VMEM budget ---------------------------------------
    # v5e/v6e: 128 MiB physical VMEM; v7x: 64 MiB. Budget the double-buffered
    # (input + output) working set and raise the scoped VMEM limit to match,
    # leaving headroom for compiler scratch on every generation.
    try:
        vmem_physical = int(pltpu.get_tpu_info().vmem_capacity_bytes)
    except Exception:
        vmem_physical = 64 << 20  # conservative (v7x-safe) fallback
    ws_budget = min(vmem_physical // 2, 40 << 20)
    vmem_limit = min(vmem_physical * 3 // 4, ws_budget + (16 << 20))

    # --- Tile sizing --------------------------------------------------------
    col_full = -(-l_out // lane) * lane  # lane-aligned width covering l_out
    min_steps = 8                        # keep the pipeline (and 2 TCs) busy

    def pair_bytes(r, w):
        # double-buffered input block + output block of shape (r, w)
        return 4 * r * w * itemsize

    if pair_bytes(pack, col_full) <= ws_budget:
        # Row tiling only: one lane-aligned column block covering all of l_out.
        col_tile = col_full
        rows = ws_budget // (4 * col_tile * itemsize)
        # Keep ~min_steps grid steps when there is enough data, but otherwise
        # take the largest block VMEM allows (no arbitrary row cap).
        rows = min(rows, max(pack, -(-total_rows // min_steps)))
        rows = max(pack, (rows // pack) * pack)   # sublane-aligned
        if rows >= total_rows:
            rows = total_rows                     # full-dim block is always legal
    else:
        # Very long sequences: also tile the length axis in multiples of 128
        # so the working set stays inside the budget (avoids VMEM OOM).
        rows = total_rows if total_rows < pack else pack
        col_tile = max(lane, (ws_budget // (4 * rows * itemsize)) // lane * lane)

    row_steps = pl.cdiv(total_rows, rows)
    col_steps = pl.cdiv(l_out, col_tile)
    grid = (row_steps, col_steps)

    block = pl.BlockSpec((rows, col_tile), lambda i, j: (i, j))

    in_cols_read = min(l, col_steps * col_tile)
    cost = pl.CostEstimate(
        flops=0,
        transcendentals=0,
        bytes_accessed=total_rows * (in_cols_read + l_out) * itemsize,
    )

    y2 = pl.pallas_call(
        _copy_kernel,
        out_shape=jax.ShapeDtypeStruct((total_rows, l_out), x.dtype),
        grid_spec=pltpu.PrefetchScalarGridSpec(
            num_scalar_prefetch=0,
            grid=grid,
            in_specs=[block],
            out_specs=block,
        ),
        compiler_params=pltpu.CompilerParams(
            dimension_semantics=("parallel", "parallel"),
            vmem_limit_bytes=int(vmem_limit),
        ),
        cost_estimate=cost,
    )(x2)

    return y2.reshape(n, c, l_out)


if __name__ == "__main__":
    key = jax.random.PRNGKey(0)

    # Case 1: misaligned L_out (partial lane-group, masked output stores).
    N, C, L = 2, 4, 16
    chomp_size = 3
    x = jax.random.normal(key, (N, C, L), dtype=jnp.float32)

    y = chomp1d(x, chomp_size)
    jax.block_until_ready(y)
    y_ref = x[:, :, :-chomp_size]
    assert y.shape == (N, C, L - chomp_size)
    assert jnp.array_equal(y, y_ref)

    # Case 2: lane-aligned L_out (pure full-width pass-through copy).
    key2 = jax.random.PRNGKey(1)
    N2, C2, L2, chomp2 = 2, 8, 256, 128
    x2 = jax.random.normal(key2, (N2, C2, L2), dtype=jnp.float32)
    y2 = chomp1d(x2, chomp2)
    jax.block_until_ready(y2)
    assert y2.shape == (N2, C2, L2 - chomp2)
    assert jnp.array_equal(y2, x2[:, :, :-chomp2])

    # Case 3: chomp_size == 0 identity path.
    y0 = chomp1d(x, 0)
    jax.block_until_ready(y0)
    assert jnp.array_equal(y0, x)

    print("KERNEL_OK")
</pallas_src>

<mosaic_0001>
module attributes {stable_mosaic.version = 11 : i64} {
  func.func @_copy_kernel(%arg0: i32, %arg1: i32, %arg2: memref<8x128xf32, #tpu.memory_space<vmem>>, %arg3: memref<8x128xf32, #tpu.memory_space<vmem>>) attributes {dimension_semantics = [#tpu.dimension_semantics<parallel>, #tpu.dimension_semantics<parallel>], iteration_bounds = array<i64: 1, 1>, scalar_prefetch = 0 : i64, scratch_operands = 0 : i64, tpu.core_type = #tpu.core_type<tc>, window_params = [{transform_indices = @transform_0, window_bounds = array<i64: 8, 128>}, {transform_indices = @transform_1, window_bounds = array<i64: 8, 128>}]} {
    %c0 = arith.constant 0 : index
    %c0_0 = arith.constant 0 : index
    %0 = vector.load %arg2[%c0, %c0_0] : memref<8x128xf32, #tpu.memory_space<vmem>>, vector<8x128xf32>
    %c0_1 = arith.constant 0 : index
    %c0_2 = arith.constant 0 : index
    %1 = vector.load %arg3[%c0_1, %c0_2] : memref<8x128xf32, #tpu.memory_space<vmem>>, vector<8x128xf32>
    tpu.vector_store %arg3[%c0_1, %c0_2], %0 {strides = array<i32>} : memref<8x128xf32, #tpu.memory_space<vmem>>, vector<8x128xf32>,
    return
  }
  func.func @transform_0(%arg0: i32, %arg1: i32) -> (i32, i32) {
    %c0_i32 = arith.constant 0 : i32
    return %arg0, %arg1 : i32, i32
  }
  func.func @transform_1(%arg0: i32, %arg1: i32) -> (i32, i32) {
    %c0_i32 = arith.constant 0 : i32
    return %arg0, %arg1 : i32, i32
  }
}

</mosaic_0001>

<bundles_post_ra>
// kernel: tpu_custom_call.1
= control target key start
LH: loop header
LB: loop body
LE: loop exit
PB: predicated region body
PF: predicated region fallthrough
CT: control target
= control target key end

     0   :  { %6 = vsyncpa [#allocation3], 0  ;;  %s102_s0 = inlined_call_operand.hbm [shape: f32[8,16], index: 0, kind: input, shape index: {}]   ;;  %s103_s1 = inlined_call_operand.hbm [shape: f32[8,13], index: 1, kind: output, shape index: {}]  }
   0x1   :  { %7 = vsyncpa [#allocation4], 0  ;;  %s84_s6 = smov [#allocation2]  }
   0x2   :  { %s14_s7 = sshll.u32 %s84_s6, 4  ;;  %s15_s7 = int_to_ptr.vmem [resolvable:$true] %s14_s7 }
   0x3   :  { %s48_s8 = scalar_lea.vmem %s15_s7, 128  ;;  %p53_p1 = scmp.lt.s32.totalorder %s15_s7, %s15_s7 }
   0x4   :  { %p49_p0 = scmp.ne.s32.totalorder %s15_s7, %s48_s8  ;;  %p54_p2 = scmp.lt.s32.totalorder %s48_s8, %s48_s8 }
   0x6   :  { %p55_p3 = por %p54_p2, %p53_p1 }
   0x8   :  { %p56_p4 = pnand %p55_p3, %p49_p0 }
   0xa   :  { %59 = shalt.err (!%p56_p4)
}
   0xb   :  { %17 = dma.hbm_to_vmem [thread:$0]  %s102_s0, 128, %s15_s7, [#allocation3]  }
   0xc   :  { %80 = dma.done.wait [#allocation3], 128  }
   0xd   :  { %81 = vsyncadd [#allocation3], 4294967168  ;;  %s85_s11 = smov [#allocation5]   ;;  %v21_v0 = vld [vmem:[#allocation2] sm:$0xff] }
   0xe   :  { %s29_s12 = sshll.u32 %s85_s11, 4  ;;  %22 = vst [vmem:[#allocation5] sm:$0xff] %v21_v0  ;;  %s30_s12 = int_to_ptr.vmem [resolvable:$true] %s29_s12 }
   0xf   :  { %s60_s13 = scalar_lea.vmem %s30_s12, 128  ;;  %p65_p6 = scmp.lt.s32.totalorder %s30_s12, %s30_s12 }
  0x10   :  { %p61_p5 = scmp.ne.s32.totalorder %s30_s12, %s60_s13  ;;  %p66_p7 = scmp.lt.s32.totalorder %s60_s13, %s60_s13 }
  0x12   :  { %p67_p8 = por %p66_p7, %p65_p6 }
  0x14   :  { %p68_p9 = pnand %p67_p8, %p61_p5 }
  0x16   :  { %71 = shalt.err (!%p68_p9)
}
  0x17   :  { %32 = dma.vmem_to_hbm [thread:$0]  %s30_s12, 128, %s103_s1, [#allocation4]  }
  0x18   :  { %82 = dma.done.wait [#allocation4], 128  }
  0x19   :  { %83 = vsyncadd [#allocation4], 4294967168 }
  0x1a   :  { %36 = vsyncpa [#allocation3], 1 }
  0x1b   :  { %37 = vsyncpa [#allocation4], 1 }

</bundles_post_ra>
